<compile_context>
chip_gen: v7x
topology: tpu7x:2x2x1
jax: 0.10.0
libtpu: 0.0.40
codegen_flags: <defaults>
</compile_context>

<pallas_src>
import jax
import jax.numpy as jnp
from jax.experimental import pallas as pl
from jax.experimental.pallas import tpu as pltpu


def _se_gate_kernel(g_ref, x_ref, o_ref):
    # g_ref: (1, 1, TC), x_ref / o_ref: (1, HW, TC)
    g = jax.nn.sigmoid(g_ref[...].astype(jnp.float32)).astype(x_ref.dtype)
    o_ref[...] = x_ref[...] * g


def _is_dual_tensorcore_chip():
    """True only on chips with two TensorCores (v7x); safe fallback is False."""
    try:
        kind = jax.devices()[0].device_kind.lower()
    except Exception:
        return False
    return ("v7" in kind) or ("7x" in kind)


def se_gate_nhwc(gate_nc, x_nhwc):
    """Core lane-dense kernel. gate_nc: [N, C], x_nhwc: [N, H, W, C] -> [N, H, W, C].

    View-only reshapes (no transposes) when the producer is channels-minor.
    """
    N, H, W, C = x_nhwc.shape
    assert gate_nc.shape == (N, C)
    HW = H * W

    x3 = x_nhwc.reshape(N, HW, C)      # view-only
    g3 = gate_nc.reshape(N, 1, C)      # view-only

    # Lane-axis split only where it buys anything (2 TensorCores on v7x),
    # and only if both halves stay lane-dense (multiples of 128).
    c_splits = 2 if (_is_dual_tensorcore_chip() and C % 256 == 0) else 1
    tc = C // c_splits
    grid = (N, c_splits)

    x_itemsize = jnp.dtype(x_nhwc.dtype).itemsize
    g_itemsize = jnp.dtype(gate_nc.dtype).itemsize
    cost = pl.CostEstimate(
        flops=N * HW * C,                 # one multiply per element
        transcendentals=N * C,            # one sigmoid per (n, c)
        bytes_accessed=2 * N * HW * C * x_itemsize + N * C * g_itemsize,
    )

    out3 = pl.pallas_call(
        _se_gate_kernel,
        out_shape=jax.ShapeDtypeStruct((N, HW, C), x_nhwc.dtype),
        grid_spec=pl.GridSpec(
            grid=grid,
            in_specs=[
                pl.BlockSpec((1, 1, tc), lambda n, c: (n, 0, c)),    # gate
                pl.BlockSpec((1, HW, tc), lambda n, c: (n, 0, c)),   # activation
            ],
            out_specs=pl.BlockSpec((1, HW, tc), lambda n, c: (n, 0, c)),
        ),
        compiler_params=pltpu.CompilerParams(
            dimension_semantics=("parallel", "parallel"),
        ),
        cost_estimate=cost,
    )(g3, x3)

    return out3.reshape(N, H, W, C)


def sigmoid_mul_nchw(gate_nchw, x_nchw):
    """Module-faithful adapter: gate [N, C, 1, 1], x [N, C, H, W] -> [N, C, H, W].

    In a real NHWC-layout model call `se_gate_nhwc` directly (no transposes).
    """
    N, C, H, W = x_nchw.shape
    assert gate_nchw.shape == (N, C, 1, 1)
    x_nhwc = jnp.transpose(x_nchw, (0, 2, 3, 1))        # layout plumbing only
    out_nhwc = se_gate_nhwc(gate_nchw.reshape(N, C), x_nhwc)
    return jnp.transpose(out_nhwc, (0, 3, 1, 2))


if __name__ == "__main__":
    key = jax.random.PRNGKey(0)
    k1, k2, k3, k4 = jax.random.split(key, 4)

    # Small shapes consistent with the module's SE-gate pattern.
    N, C, H, W = 2, 256, 7, 7
    x815 = jax.random.normal(k1, (N, C, H, W), dtype=jnp.float32)
    x819 = jax.random.normal(k2, (N, C, 1, 1), dtype=jnp.float32)

    out = sigmoid_mul_nchw(x819, x815)
    jax.block_until_ready(out)

    ref = jax.nn.sigmoid(x819) * x815
    assert out.shape == (N, C, H, W)
    assert jnp.allclose(out, ref, atol=1e-5, rtol=1e-5)

    # Also check the module's true shape ([1, 3840, 7, 7]); still tiny (~1.5 MB).
    xf = jax.random.normal(k3, (1, 3840, 7, 7), dtype=jnp.float32)
    gf = jax.random.normal(k4, (1, 3840, 1, 1), dtype=jnp.float32)
    outf = sigmoid_mul_nchw(gf, xf)
    jax.block_until_ready(outf)
    reff = jax.nn.sigmoid(gf) * xf
    assert jnp.allclose(outf, reff, atol=1e-5, rtol=1e-5)

    print("KERNEL_OK")
</pallas_src>

<mosaic_0001>
module attributes {stable_mosaic.version = 11 : i64} {
  func.func @_se_gate_kernel(%arg0: i32, %arg1: i32, %arg2: memref<1x1x256xf32, #tpu.memory_space<vmem>>, %arg3: memref<1x49x256xf32, #tpu.memory_space<vmem>>, %arg4: memref<1x49x256xf32, #tpu.memory_space<vmem>>) attributes {dimension_semantics = [#tpu.dimension_semantics<parallel>, #tpu.dimension_semantics<parallel>], iteration_bounds = array<i64: 2, 1>, scalar_prefetch = 0 : i64, scratch_operands = 0 : i64, tpu.core_type = #tpu.core_type<tc>, window_params = [{transform_indices = @transform_0, window_bounds = array<i64: 1, 1, 256>}, {transform_indices = @transform_1, window_bounds = array<i64: 1, 49, 256>}, {transform_indices = @transform_2, window_bounds = array<i64: 1, 49, 256>}]} {
    %c0 = arith.constant 0 : index
    %c0_0 = arith.constant 0 : index
    %c0_1 = arith.constant 0 : index
    %0 = vector.load %arg2[%c0, %c0_0, %c0_1] : memref<1x1x256xf32, #tpu.memory_space<vmem>>, vector<1x1x256xf32>
    %1 = arith.negf %0 : vector<1x1x256xf32>
    %2 = math.exp %1 : vector<1x1x256xf32>
    %cst = arith.constant 1.000000e+00 : f32
    %3 = vector.broadcast %cst : f32 to vector<1x1x256xf32>
    %4 = arith.addf %3, %2 : vector<1x1x256xf32>
    %5 = arith.divf %3, %4 : vector<1x1x256xf32>
    %c0_2 = arith.constant 0 : index
    %c0_3 = arith.constant 0 : index
    %c0_4 = arith.constant 0 : index
    %6 = vector.load %arg3[%c0_2, %c0_3, %c0_4] : memref<1x49x256xf32, #tpu.memory_space<vmem>>, vector<1x49x256xf32>
    %7 = vector.broadcast %5 : vector<1x1x256xf32> to vector<1x49x256xf32>
    %8 = arith.mulf %6, %7 : vector<1x49x256xf32>
    %c0_5 = arith.constant 0 : index
    %c0_6 = arith.constant 0 : index
    %c0_7 = arith.constant 0 : index
    %9 = vector.load %arg4[%c0_5, %c0_6, %c0_7] : memref<1x49x256xf32, #tpu.memory_space<vmem>>, vector<1x49x256xf32>
    tpu.vector_store %arg4[%c0_5, %c0_6, %c0_7], %8 {strides = array<i32>} : memref<1x49x256xf32, #tpu.memory_space<vmem>>, vector<1x49x256xf32>,
    return
  }
  func.func @transform_0(%arg0: i32, %arg1: i32) -> (i32, i32, i32) {
    %c0_i32 = arith.constant 0 : i32
    %c0_i32_0 = arith.constant 0 : i32
    return %arg0, %c0_i32, %arg1 : i32, i32, i32
  }
  func.func @transform_1(%arg0: i32, %arg1: i32) -> (i32, i32, i32) {
    %c0_i32 = arith.constant 0 : i32
    %c0_i32_0 = arith.constant 0 : i32
    return %arg0, %c0_i32, %arg1 : i32, i32, i32
  }
  func.func @transform_2(%arg0: i32, %arg1: i32) -> (i32, i32, i32) {
    %c0_i32 = arith.constant 0 : i32
    %c0_i32_0 = arith.constant 0 : i32
    return %arg0, %c0_i32, %arg1 : i32, i32, i32
  }
}

</mosaic_0001>

<bundles_post_ra>
// kernel: tpu_custom_call.1
= control target key start
LH: loop header
LB: loop body
LE: loop exit
PB: predicated region body
PF: predicated region fallthrough
CT: control target
= control target key end

     0   :  { %s457_s9 = smov 0   ;;  %s459_s10 = smov 0   ;;  %s509_s0 = inlined_call_operand.vmem [shape: f32[2,1,256], index: 0, kind: input, shape index: {}]   ;;  %s510_s1 = inlined_call_operand.vmem [shape: f32[2,49,256], index: 1, kind: input, shape index: {}]   ;;  %s511_s2 = inlined_call_operand.vmem [shape: f32[2,49,256], index: 2, kind: output, shape index: {}]  }
   0x1   :  { %s461_s11 = smov 0  }
   0x2 LB: > { %s24_s12 = sadd.s32 1, %s436_s10  ;;  %p382_p0 = scmp.ge.s32.totalorder %s440_s11, 1  ;;  %s440_s11 = sphi %s461_s11, %s12_s11   ;;  %s436_s10 = sphi %s459_s10, %s513_s10   ;;  %s432_s9 = sphi %s457_s9, %s512_s9  }
   0x3   : > { %p26_p1 = scmp.ge.s32.totalorder %s24_s12, 2  ;;  %p149_p2 = scmp.lt.s32.totalorder %s440_s11, 3 }
   0x5   : > { %s515_s12 = smov (%p26_p1, %s24_s12), 0  ;;  %p150_p3 = pnand %p382_p0, %p149_p2 }
   0x6   : > { %p188_p4 = scmp.lt.s32.totalorder (!%p150_p3), %s432_s9, 1  ;;  %v238_v4 = vlaneseq (!%p150_p3) }
   0x7   : > { %153 = sbr.rel (%p150_p3) target bundleno = 55 (0x37), region = 28 }
   0x8   : > { %v239_v5 = vshrl.u32 (!%p150_p3), %v238_v4, 7 }
   0xa   : > { %v240_v6 = vsub.s32 (!%p150_p3), 0, %v239_v5  ;;  %v244_v7 = vsub.s32 (!%p150_p3), 1, %v239_v5 }
   0xe   : > { %s517_s9 = smov (!%p188_p4, %s432_s9), 1 }
   0xf   : > { %s383_s13 = sshll.u32 %s517_s9, 1  ;;  %s389_s17 = smul.u32 112, %s517_s9 }
  0x10   : > { %s194_s16 = scalar_lea.vmem %s509_s0, %s383_s13 }
  0x11   : > { %v216_v0 = vld [vmem:[%s194_s16] sm:$0x3]  ;;  %s204_s20 = scalar_lea.vmem %s510_s1, %s389_s17  ;;  %s484_s23 = scalar_lea.vmem %s511_s2, %s389_s17 }
  0x12   : > { %v386_v1 = vmul.f32 -1.442695, %v216_v0  ;;  %v223_v8 = vld [vmem:[%s204_s20] sm:$0xff]  ;;  %v224_v9 = vld [vmem:[%s204_s20 + $0x8] sm:$0xff]  ;;  %v225_v10 = vld [vmem:[%s204_s20 + $0x10] sm:$0xff] }
  0x13   : > { %v226_v12 = vld [vmem:[%s204_s20 + $0x18] sm:$0xff]  ;;  %v227_v13 = vld [vmem:[%s204_s20 + $0x20] sm:$0xff]  ;;  %v228_v14 = vld [vmem:[%s204_s20 + $0x28] sm:$0xff] }
  0x14   : > { %414 = vpow2.f32 %v386_v1  ;;  %v229_v17 = vld [vmem:[%s204_s20 + $0x30] sm:$0xff]  ;;  %v230_v18 = vld [vmem:[%s204_s20 + $0x38] sm:$0xff]  ;;  %v231_v19 = vld [vmem:[%s204_s20 + $0x40] sm:$0xff] }
  0x15   : > { %v232_v20 = vld [vmem:[%s204_s20 + $0x48] sm:$0xff]  ;;  %v233_v21 = vld [vmem:[%s204_s20 + $0x50] sm:$0xff]  ;;  %v234_v22 = vld [vmem:[%s204_s20 + $0x58] sm:$0xff] }
  0x16   : > { %v235_v27 = vld [vmem:[%s204_s20 + $0x60] sm:$0x1]  ;;  %v236_v28 = vld [vmem:[%s204_s20 + $0x68] sm:$0x1] }
  0x1e   : > { %v415_v2 = vpop.eup %414 }
  0x1f   : > { %v220_v3 = vadd.f32 1.0, %v415_v2 }
  0x21   : > { %416 = vrcp.f32 %v220_v3 }
  0x2b   : > { %v417_v11 = vpop.eup %416 }
  0x2c   : > { %v241_v15 = vrot.slane %v417_v11, %v240_v6  ;;  %v245_v16 = vrot.slane %v417_v11, %v244_v7 }
  0x2e   : > { %v248_v23 = vmul.f32 %v241_v15, %v223_v8  ;;  %v249_v24 = vmul.f32 %v245_v16, %v224_v9  ;;  %v250_v25 = vmul.f32 %v241_v15, %v225_v10  ;;  %v251_v26 = vmul.f32 %v245_v16, %v226_v12 }
  0x2f   : > { %v252_v29 = vmul.f32 %v241_v15, %v227_v13  ;;  %v253_v30 = vmul.f32 %v245_v16, %v228_v14  ;;  %v254_v31 = vmul.f32 %v241_v15, %v229_v17  ;;  %v255_v32 = vmul.f32 %v245_v16, %v230_v18 }
  0x30   : > { %262 = vst [vmem:[%s484_s23] sm:$0xff] %v248_v23  ;;  %263 = vst [vmem:[%s484_s23 + $0x8] sm:$0xff] %v249_v24  ;;  %v256_v33 = vmul.f32 %v241_v15, %v231_v19  ;;  %v257_v34 = vmul.f32 %v245_v16, %v232_v20  ;;  %v258_v35 = vmul.f32 %v241_v15, %v233_v21 }
  0x31   : > { %264 = vst [vmem:[%s484_s23 + $0x10] sm:$0xff] %v250_v25  ;;  %265 = vst [vmem:[%s484_s23 + $0x18] sm:$0xff] %v251_v26  ;;  %v259_v36 = vmul.f32 %v245_v16, %v234_v22  ;;  %v260_v37 = vmul.f32 %v241_v15, %v235_v27  ;;  %v261_v38 = vmul.f32 %v245_v16, %v236_v28 }
  0x32   : > { %266 = vst [vmem:[%s484_s23 + $0x20] sm:$0xff] %v252_v29  ;;  %267 = vst [vmem:[%s484_s23 + $0x28] sm:$0xff] %v253_v30 }
  0x33   : > { %268 = vst [vmem:[%s484_s23 + $0x30] sm:$0xff] %v254_v31  ;;  %269 = vst [vmem:[%s484_s23 + $0x38] sm:$0xff] %v255_v32 }
  0x34   : > { %270 = vst [vmem:[%s484_s23 + $0x40] sm:$0xff] %v256_v33  ;;  %271 = vst [vmem:[%s484_s23 + $0x48] sm:$0xff] %v257_v34 }
  0x35   : > { %272 = vst [vmem:[%s484_s23 + $0x50] sm:$0xff] %v258_v35  ;;  %273 = vst [vmem:[%s484_s23 + $0x58] sm:$0xff] %v259_v36 }
  0x36   : > { %274 = vst [vmem:[%s484_s23 + $0x60] sm:$0x1] %v260_v37  ;;  %275 = vst [vmem:[%s484_s23 + $0x68] sm:$0x1] %v261_v38 }
  0x37 PF: > { %s12_s11 = sadd.s32 1, %s440_s11   ;;  %s512_s9 = smov %s436_s10 }
  0x38   : > { %p9_p5 = scmp.ge.s32.totalorder %s12_s11, 4   ;;  %s513_s10 = smov %s515_s12 }
  0x3a   :  { %11 = sbr.rel (!%p9_p5) target bundleno = 2 (0x2), region = 61 }

</bundles_post_ra>
